<compile_context>
chip_gen: v7x
topology: tpu7x:2x2x1
jax: 0.10.0
libtpu: 0.0.40
codegen_flags: <defaults>
</compile_context>

<pallas_src>
import functools

import jax
import jax.numpy as jnp
from jax import lax
from jax.experimental import pallas as pl
from jax.experimental.pallas import tpu as pltpu


_GOLDEN = 0x9E3779B9              # golden-ratio stream-offset constant
_SMALL_MAX_BATCH = 1 << 20        # <= 4 MiB slab -> single un-gridded block
_TILE_LANES = 32768               # gridded path: (8, 32768) f32 = 1 MiB / block


def _bits_to_unit_float(bits_u32):
    """uint32 bits -> uniform [0, 1) float32 via the mantissa bit-trick."""
    f = lax.bitcast_convert_type(
        (bits_u32 >> 9) | jnp.uint32(0x3F800000), jnp.float32
    )
    return f - jnp.float32(1.0)


def _splitmix_bits(shape, stream_offset_u32):
    """Counter-based splitmix32/lowbias32 hash (pure VPU ops). Fallback path."""
    rows, cols = shape
    row = lax.broadcasted_iota(jnp.int32, shape, 0)
    col = lax.broadcasted_iota(jnp.int32, shape, 1)
    # In-block counter fits int32 easily; cast to uint32 before mixing.
    x = (row * cols + col).astype(jnp.uint32) + stream_offset_u32
    x = x ^ (x >> 16)
    x = x * jnp.uint32(0x7FEB352D)
    x = x ^ (x >> 15)
    x = x * jnp.uint32(0x846CA68B)
    x = x ^ (x >> 16)
    return x


def _hw_random_bits(shape):
    bits = pltpu.prng_random_bits(shape)
    if bits.dtype != jnp.uint32:               # some versions return int32
        bits = pltpu.bitcast(bits, jnp.uint32)
    return bits


# ----------------------------------------------------------------------------
# Small-batch path: single (8, lanes) block, no grid (minimal launch overhead).
# ----------------------------------------------------------------------------
def _rand_kernel_single(seed_ref, o_ref, *, use_hw_prng):
    if use_hw_prng:
        pltpu.prng_seed(seed_ref[0])
        bits = _hw_random_bits(o_ref.shape)
    else:
        off = seed_ref[0].astype(jnp.uint32) * jnp.uint32(_GOLDEN)
        bits = _splitmix_bits(o_ref.shape, off)
    o_ref[...] = _bits_to_unit_float(bits)


@functools.partial(jax.jit, static_argnames=("batch", "use_hw_prng"))
def _rand_small(seed, batch, use_hw_prng):
    lanes = 128 * max(1, pl.cdiv(batch, 8 * 128))
    slab = pl.pallas_call(
        functools.partial(_rand_kernel_single, use_hw_prng=use_hw_prng),
        out_shape=jax.ShapeDtypeStruct((8, lanes), jnp.float32),
        in_specs=[pl.BlockSpec(memory_space=pltpu.SMEM)],
        out_specs=pl.BlockSpec(memory_space=pltpu.VMEM),
    )(seed)
    return _slab_to_out(slab, batch)


# ----------------------------------------------------------------------------
# Large-batch path: 1-D grid over lane tiles -> pipelined writeback, bounded
# VMEM (v7x-safe), parallel semantics for v7x's two TensorCores.
# ----------------------------------------------------------------------------
def _rand_kernel_tiled(seed_ref, o_ref, *, use_hw_prng):
    i = pl.program_id(0)
    if use_hw_prng:
        pltpu.prng_seed(seed_ref[0], i)        # independent stream per block
        bits = _hw_random_bits(o_ref.shape)
    else:
        rows, cols = o_ref.shape
        off = (
            seed_ref[0].astype(jnp.uint32) * jnp.uint32(_GOLDEN)
            + (i * (rows * cols)).astype(jnp.uint32)
        )
        bits = _splitmix_bits(o_ref.shape, off)
    o_ref[...] = _bits_to_unit_float(bits)


@functools.partial(jax.jit, static_argnames=("batch", "use_hw_prng"))
def _rand_large(seed, batch, use_hw_prng):
    n_blocks = pl.cdiv(batch, 8 * _TILE_LANES)
    lanes = n_blocks * _TILE_LANES
    slab = pl.pallas_call(
        functools.partial(_rand_kernel_tiled, use_hw_prng=use_hw_prng),
        out_shape=jax.ShapeDtypeStruct((8, lanes), jnp.float32),
        grid_spec=pltpu.PrefetchScalarGridSpec(
            num_scalar_prefetch=1,
            grid=(n_blocks,),
            in_specs=[],
            out_specs=pl.BlockSpec((8, _TILE_LANES), lambda i, seed: (0, i)),
        ),
        compiler_params=pltpu.CompilerParams(
            dimension_semantics=("parallel",),
        ),
    )(seed)
    return _slab_to_out(slab, batch)


def _slab_to_out(slab, batch):
    # Row-major (8, lanes) flatten is contiguous; when batch is an exact
    # multiple of the slab size this is a free reshape (no extra HBM traffic).
    flat = slab.reshape(-1)
    if flat.shape[0] == batch:
        return flat.reshape(batch, 1)
    # Padding present: trailing slice copies only batch*4 bytes.
    return flat[:batch].reshape(batch, 1)


def _default_use_hw_prng():
    try:
        return jax.devices()[0].platform == "tpu"
    except Exception:  # pragma: no cover
        return False


class SampleFusionModelPallas:
    """JAX/Pallas port of SampleFusionModel.

    ParentFusionModel.__init__ only stashes prediction_task / data_dims /
    multiclass_dimensions; this subclass defines no parameters and its
    forward ignores the input, so there are no weights to initialize.
    """

    def __init__(self, prediction_task, data_dims, multiclass_dimensions, seed=0):
        self.prediction_task = prediction_task
        self.data_dims = data_dims
        self.multiclass_dimensions = multiclass_dimensions
        self._base_seed = int(seed)
        # NOTE: the Python-side counter only advances in eager execution; if
        # forward() is itself traced under jit/scan, the seed is baked per
        # trace (same caveat as any host-side RNG state).
        self._call_count = 0
        self._use_hw_prng = _default_use_hw_prng()

    def forward(self, x):
        batch = int(x.shape[0])
        seed = jnp.asarray([self._base_seed + self._call_count], dtype=jnp.int32)
        self._call_count += 1
        if batch <= _SMALL_MAX_BATCH:
            out = _rand_small(seed, batch, self._use_hw_prng)
        else:
            out = _rand_large(seed, batch, self._use_hw_prng)
        return [out]  # matches the PyTorch list-of-one-tensor return


if __name__ == "__main__":
    key = jax.random.PRNGKey(0)
    # Small image-like input, NCHW, consistent with a fusion-model modality.
    x = jax.random.normal(key, (2, 4, 16, 16), dtype=jnp.float32)

    model = SampleFusionModelPallas(
        prediction_task="regression",
        data_dims=[x.shape[1] * x.shape[2] * x.shape[3], None, None],
        multiclass_dimensions=None,
        seed=0,
    )

    out_list = model.forward(x)
    out = jax.block_until_ready(out_list[0])

    assert out.shape == (x.shape[0], 1), out.shape
    assert out.dtype == jnp.float32, out.dtype
    assert bool(jnp.all(out >= 0.0)) and bool(jnp.all(out < 1.0)), "values outside [0,1)"

    # Light smoke test of the gridded large-batch path (2 lane tiles, ~2 MiB).
    big_batch = 2 * 8 * _TILE_LANES
    big_seed = jnp.asarray([123], dtype=jnp.int32)
    big = jax.block_until_ready(_rand_large(big_seed, big_batch, model._use_hw_prng))
    assert big.shape == (big_batch, 1), big.shape
    assert bool(jnp.all(big >= 0.0)) and bool(jnp.all(big < 1.0)), "values outside [0,1)"

    print("KERNEL_OK")
</pallas_src>

<mosaic_0001>
module attributes {stable_mosaic.version = 11 : i64} {
  func.func @_rand_kernel_single(%arg0: memref<1xi32, #tpu.memory_space<smem>>, %arg1: memref<8x128xf32, #tpu.memory_space<vmem>>) attributes {dimension_semantics = [], scalar_prefetch = 0 : i64, scratch_operands = 0 : i64, tpu.core_type = #tpu.core_type<tc>} {
    %c0 = arith.constant 0 : index
    %0 = memref.load %arg0[%c0] : memref<1xi32, #tpu.memory_space<smem>>
    %c-1640531527_i32 = arith.constant -1640531527 : i32
    %1 = arith.muli %0, %c-1640531527_i32 : i32
    %2 = tpu.iota {dimensions = array<i32: 0>} : vector<8x128xi32>
    %3 = tpu.iota {dimensions = array<i32: 1>} : vector<8x128xi32>
    %c128_i32 = arith.constant 128 : i32
    %4 = vector.broadcast %c128_i32 : i32 to vector<8x128xi32>
    %5 = arith.muli %2, %4 : vector<8x128xi32>
    %6 = arith.addi %5, %3 : vector<8x128xi32>
    %7 = vector.broadcast %1 : i32 to vector<8x128xi32>
    %8 = arith.addi %6, %7 : vector<8x128xi32>
    %c16_i32 = arith.constant 16 : i32
    %9 = vector.broadcast %c16_i32 : i32 to vector<8x128xi32>
    %10 = arith.shrui %8, %9 : vector<8x128xi32>
    %11 = arith.xori %8, %10 : vector<8x128xi32>
    %c2146121005_i32 = arith.constant 2146121005 : i32
    %12 = vector.broadcast %c2146121005_i32 : i32 to vector<8x128xi32>
    %13 = arith.muli %11, %12 : vector<8x128xi32>
    %c15_i32 = arith.constant 15 : i32
    %14 = vector.broadcast %c15_i32 : i32 to vector<8x128xi32>
    %15 = arith.shrui %13, %14 : vector<8x128xi32>
    %16 = arith.xori %13, %15 : vector<8x128xi32>
    %c-2073254261_i32 = arith.constant -2073254261 : i32
    %17 = vector.broadcast %c-2073254261_i32 : i32 to vector<8x128xi32>
    %18 = arith.muli %16, %17 : vector<8x128xi32>
    %c16_i32_0 = arith.constant 16 : i32
    %19 = vector.broadcast %c16_i32_0 : i32 to vector<8x128xi32>
    %20 = arith.shrui %18, %19 : vector<8x128xi32>
    %21 = arith.xori %18, %20 : vector<8x128xi32>
    %c9_i32 = arith.constant 9 : i32
    %22 = vector.broadcast %c9_i32 : i32 to vector<8x128xi32>
    %23 = arith.shrui %21, %22 : vector<8x128xi32>
    %c1065353216_i32 = arith.constant 1065353216 : i32
    %24 = vector.broadcast %c1065353216_i32 : i32 to vector<8x128xi32>
    %25 = arith.ori %23, %24 : vector<8x128xi32>
    %26 = tpu.bitcast %25 : vector<8x128xi32> -> vector<8x128xf32>
    %cst = arith.constant 1.000000e+00 : f32
    %27 = vector.broadcast %cst : f32 to vector<8x128xf32>
    %28 = arith.subf %26, %27 : vector<8x128xf32>
    %c0_1 = arith.constant 0 : index
    %c0_2 = arith.constant 0 : index
    %29 = vector.load %arg1[%c0_1, %c0_2] : memref<8x128xf32, #tpu.memory_space<vmem>>, vector<8x128xf32>
    tpu.vector_store %arg1[%c0_1, %c0_2], %28 {strides = array<i32>} : memref<8x128xf32, #tpu.memory_space<vmem>>, vector<8x128xf32>,
    return
  }
}

</mosaic_0001>

<bundles_post_ra>
// kernel: _rand_small.1
= control target key start
LH: loop header
LB: loop body
LE: loop exit
PB: predicated region body
PF: predicated region fallthrough
CT: control target
= control target key end

     0   :  { %v11_v0 = vlaneseq  ;;  %s53_s0 = inlined_call_operand.<no memory space> [shape: s32[1], index: 0, kind: input, shape index: {}]   ;;  %s54_s1 = inlined_call_operand.vmem [shape: f32[8,128], index: 1, kind: output, shape index: {}]  }
   0x1   :  { %s10_s8 = smul.u32 2654435769, %s53_s0 }
   0x2   :  { %v12_v1 = vshrl.u32 %v11_v0, 7  ;;  %v14_v2 = vand.u32 127, %v11_v0 }
   0x3   :  { %v17_v4 = vstv %s10_s8 }
   0x4   :  { %v15_v3 = vmul.u32 128, %v12_v1 }
   0x6   :  { %v16_v5 = vadd.s32 %v15_v3, %v14_v2 }
   0x8   :  { %v18_v6 = vadd.s32 %v17_v4, %v16_v5 }
   0xa   :  { %v19_v7 = vshrl.u32 %v18_v6, 16 }
   0xc   :  { %v20_v8 = vxor.u32 %v19_v7, %v18_v6 }
   0xe   :  { %v21_v9 = vmul.u32 2146121005, %v20_v8 }
  0x10   :  { %v22_v10 = vshrl.u32 %v21_v9, 15 }
  0x12   :  { %v23_v11 = vxor.u32 %v22_v10, %v21_v9 }
  0x14   :  { %v24_v12 = vmul.u32 2221713035, %v23_v11 }
  0x16   :  { %v25_v13 = vshrl.u32 %v24_v12, 16 }
  0x18   :  { %v26_v14 = vxor.u32 %v25_v13, %v24_v12 }
  0x1a   :  { %v27_v15 = vshrl.u32 %v26_v14, 9 }
  0x1c   :  { %v28_v16 = vor.u32 1065353216, %v27_v15 }
  0x1e   :  { %v36_v17 = vadd.f32 -1.0, %v28_v16 }
  0x20   :  { %31 = vst [vmem:[%s54_s1] sm:$0xff] %v36_v17 }

</bundles_post_ra>
